<compile_context>
chip_gen: v7x
topology: tpu7x:2x2x1
jax: 0.10.0
libtpu: 0.0.40
codegen_flags: <defaults>
</compile_context>

<pallas_src>
import functools

import jax
import jax.numpy as jnp
from jax import lax
from jax.experimental import pallas as pl
from jax.experimental.pallas import tpu as pltpu

H_PAD = 128      # lane-dense hidden width (real hidden = 16, zero padded)
C_PAD = 128      # lane-dense class width  (real classes = 8, zero padded)
NEG_INF = -1e30


# ------------------------------ fused kernel --------------------------------

def _net_fwd_kernel(beta_ref, x_ref, w1_ref, b1_ref, adjb_ref, w2_ref, b2_ref,
                    o_ref, *, num_classes):
    # ---- lin1 + relu (dropout is identity in eval mode) ----
    z1 = jnp.dot(x_ref[...].astype(jnp.bfloat16), w1_ref[...],
                 preferred_element_type=jnp.float32)
    h = jnp.maximum(z1 + b1_ref[...], 0.0)          # (N, H_PAD) f32, pad cols = 0

    adj_bias = adjb_ref[...]                        # (N, N) f32: 0 on edges, -1e30 off

    def agnn(h, beta):
        # F.normalize(h, p=2, dim=-1), eps-clamped; rsqrt -> EUP slot
        sq = jnp.sum(h * h, axis=-1, keepdims=True)
        xn = (h * lax.rsqrt(jnp.maximum(sq, 1e-24))).astype(jnp.bfloat16)
        # cosine similarity s[i, j] = <xn_i, xn_j> without materializing xn.T
        s = lax.dot_general(xn, xn, (((1,), (1,)), ((), ())),
                            preferred_element_type=jnp.float32)
        scores = beta * s + adj_bias                # masked in one FMA-style add
        m = jnp.max(scores, axis=-1, keepdims=True)
        e = jnp.exp(scores - m)                     # masked entries underflow to 0
        inv_l = pl.reciprocal(jnp.sum(e, axis=-1, keepdims=True), approx=True)
        alpha = (e * inv_l).astype(jnp.bfloat16)
        # aggregate with the un-normalized features
        return jnp.dot(alpha, h.astype(jnp.bfloat16),
                       preferred_element_type=jnp.float32)

    h = agnn(h, beta_ref[0])                        # prop1 (beta fixed)
    h = agnn(h, beta_ref[1])                        # prop2 (beta learnable)

    # ---- lin2 + log_softmax over the real (unpadded) class columns ----
    z2 = jnp.dot(h.astype(jnp.bfloat16), w2_ref[...],
                 preferred_element_type=jnp.float32) + b2_ref[...]
    col = lax.broadcasted_iota(jnp.int32, z2.shape, 1)
    zb = jnp.where(col < num_classes, z2, NEG_INF)  # keep padded lanes out of max/sum
    m = jnp.max(zb, axis=-1, keepdims=True)
    lse = jnp.log(jnp.sum(jnp.exp(zb - m), axis=-1, keepdims=True))
    o_ref[...] = zb - m - lse                       # valid cols correct; pad cols sliced off


# -------------------------------- wrapper ------------------------------------

_VMEM = pl.BlockSpec(memory_space=pltpu.MemorySpace.VMEM)
_SMEM = pl.BlockSpec(memory_space=pltpu.MemorySpace.SMEM)


def _pad_last(a, width):
    return jnp.pad(a, [(0, 0)] * (a.ndim - 1) + [(0, width - a.shape[-1])])


def net_forward(x, adj, params):
    n, _ = x.shape
    hidden = params["w1"].shape[1]
    num_classes = params["w2"].shape[1]

    # lane-dense, bf16 MXU operands; zero padding keeps semantics exact
    w1 = _pad_last(params["w1"], H_PAD).astype(jnp.bfloat16)           # (F, 128)
    b1 = _pad_last(params["b1"].reshape(1, -1), H_PAD).astype(jnp.float32)
    w2 = _pad_last(jnp.pad(params["w2"], ((0, H_PAD - hidden), (0, 0))),
                   C_PAD).astype(jnp.bfloat16)                         # (128, 128)
    b2 = _pad_last(params["b2"].reshape(1, -1), C_PAD).astype(jnp.float32)
    betas = jnp.asarray([params["beta1"], params["beta2"]], jnp.float32)
    # additive mask: 0 where edge (incl. self-loops), -1e30 elsewhere
    adj_bias = jnp.where(adj > 0, 0.0, NEG_INF).astype(jnp.float32)

    out = pl.pallas_call(
        functools.partial(_net_fwd_kernel, num_classes=num_classes),
        out_shape=jax.ShapeDtypeStruct((n, C_PAD), jnp.float32),
        in_specs=[_SMEM, _VMEM, _VMEM, _VMEM, _VMEM, _VMEM, _VMEM],
        out_specs=_VMEM,
    )(betas, x, w1, b1, adj_bias, w2, b2)
    return out[:, :num_classes]


# --------------------------------- main --------------------------------------

if __name__ == "__main__":
    NUM_NODES = 64        # stand-in for Cora's num_nodes
    NUM_FEATURES = 32     # stand-in for dataset.num_features
    HIDDEN = 16           # lin1 output size (as in the module)
    NUM_CLASSES = 8       # stand-in for dataset.num_classes
    NUM_EDGES = 256

    key = jax.random.PRNGKey(0)
    k_x, k_src, k_dst, k_w1, k_b1, k_w2, k_b2 = jax.random.split(key, 7)

    # node features
    x = jax.random.normal(k_x, (NUM_NODES, NUM_FEATURES), dtype=jnp.float32)

    # deterministic random graph; adj[i, j] = 1 iff edge j -> i, plus self-loops
    # (matches PyG AGNNConv add_self_loops=True, source_to_target flow)
    src = jax.random.randint(k_src, (NUM_EDGES,), 0, NUM_NODES)
    dst = jax.random.randint(k_dst, (NUM_EDGES,), 0, NUM_NODES)
    adj = jnp.zeros((NUM_NODES, NUM_NODES), dtype=jnp.float32)
    adj = adj.at[dst, src].set(1.0)
    adj = jnp.maximum(adj, jnp.eye(NUM_NODES, dtype=jnp.float32))

    # deterministic parameters (Linear weights stored as [in, out] for x @ W)
    params = {
        "w1": 0.1 * jax.random.normal(k_w1, (NUM_FEATURES, HIDDEN), jnp.float32),
        "b1": 0.1 * jax.random.normal(k_b1, (HIDDEN,), jnp.float32),
        "beta1": 1.0,   # AGNNConv(requires_grad=False): fixed beta = 1
        "beta2": 1.0,   # AGNNConv(requires_grad=True): beta initialized to 1
        "w2": 0.1 * jax.random.normal(k_w2, (HIDDEN, NUM_CLASSES), jnp.float32),
        "b2": 0.1 * jax.random.normal(k_b2, (NUM_CLASSES,), jnp.float32),
    }

    forward = jax.jit(net_forward)
    out = jax.block_until_ready(forward(x, adj, params))

    assert out.shape == (NUM_NODES, NUM_CLASSES)
    assert bool(jnp.all(jnp.isfinite(out)))
    # rows of log_softmax must exp-sum to 1
    assert jnp.allclose(jnp.sum(jnp.exp(out), axis=1), 1.0, atol=1e-4)

    print("KERNEL_OK")
</pallas_src>

<mosaic_0001>
module attributes {stable_mosaic.version = 11 : i64} {
  func.func @_net_fwd_kernel(%arg0: memref<2xf32, #tpu.memory_space<smem>>, %arg1: memref<64x32xf32, #tpu.memory_space<vmem>>, %arg2: memref<32x128xbf16, #tpu.memory_space<vmem>>, %arg3: memref<1x128xf32, #tpu.memory_space<vmem>>, %arg4: memref<64x64xf32, #tpu.memory_space<vmem>>, %arg5: memref<128x128xbf16, #tpu.memory_space<vmem>>, %arg6: memref<1x128xf32, #tpu.memory_space<vmem>>, %arg7: memref<64x128xf32, #tpu.memory_space<vmem>>) attributes {dimension_semantics = [], scalar_prefetch = 0 : i64, scratch_operands = 0 : i64, tpu.core_type = #tpu.core_type<tc>} {
    %c0 = arith.constant 0 : index
    %c0_0 = arith.constant 0 : index
    %0 = vector.load %arg1[%c0, %c0_0] : memref<64x32xf32, #tpu.memory_space<vmem>>, vector<64x32xf32>
    %1 = arith.truncf %0 : vector<64x32xf32> to vector<64x32xbf16>
    %c0_1 = arith.constant 0 : index
    %c0_2 = arith.constant 0 : index
    %2 = vector.load %arg2[%c0_1, %c0_2] : memref<32x128xbf16, #tpu.memory_space<vmem>>, vector<32x128xbf16>
    %cst = arith.constant dense<0.000000e+00> : vector<64x128xf32>
    %3 = tpu.matmul %1, %2, %cst {dimension_numbers = #tpu.dot_dimension_numbers<[1], [0], [0], [1], [0, 0, 1, 1], [], []>} : vector<64x32xbf16>, vector<32x128xbf16>, vector<64x128xf32> -> vector<64x128xf32>
    %c0_3 = arith.constant 0 : index
    %c0_4 = arith.constant 0 : index
    %4 = vector.load %arg3[%c0_3, %c0_4] : memref<1x128xf32, #tpu.memory_space<vmem>>, vector<1x128xf32>
    %5 = vector.broadcast %4 : vector<1x128xf32> to vector<64x128xf32>
    %6 = arith.addf %3, %5 : vector<64x128xf32>
    %cst_5 = arith.constant 0.000000e+00 : f32
    %7 = vector.broadcast %cst_5 : f32 to vector<64x128xf32>
    %8 = arith.maximumf %6, %7 : vector<64x128xf32>
    %c0_6 = arith.constant 0 : index
    %c0_7 = arith.constant 0 : index
    %9 = vector.load %arg4[%c0_6, %c0_7] : memref<64x64xf32, #tpu.memory_space<vmem>>, vector<64x64xf32>
    %c0_8 = arith.constant 0 : index
    %10 = memref.load %arg0[%c0_8] : memref<2xf32, #tpu.memory_space<smem>>
    %11 = arith.mulf %8, %8 : vector<64x128xf32>
    %cst_9 = arith.constant dense<0.000000e+00> : vector<64xf32>
    %12 = vector.multi_reduction <add>, %11, %cst_9 [1] : vector<64x128xf32> to vector<64xf32>
    %13 = vector.shape_cast %12 : vector<64xf32> to vector<64x1xf32>
    %cst_10 = arith.constant 1.000000e-24 : f32
    %14 = vector.broadcast %cst_10 : f32 to vector<64x1xf32>
    %15 = arith.maximumf %13, %14 : vector<64x1xf32>
    %16 = math.rsqrt %15 : vector<64x1xf32>
    %17 = vector.broadcast %16 : vector<64x1xf32> to vector<64x128xf32>
    %18 = arith.mulf %8, %17 : vector<64x128xf32>
    %19 = arith.truncf %18 : vector<64x128xf32> to vector<64x128xbf16>
    %cst_11 = arith.constant dense<0.000000e+00> : vector<64x64xf32>
    %20 = tpu.matmul %19, %19, %cst_11 {dimension_numbers = #tpu.dot_dimension_numbers<[1], [1], [0], [0], [0, 0, 1, 0], [], []>} : vector<64x128xbf16>, vector<64x128xbf16>, vector<64x64xf32> -> vector<64x64xf32>
    %21 = vector.broadcast %10 : f32 to vector<64x64xf32>
    %22 = arith.mulf %21, %20 : vector<64x64xf32>
    %23 = arith.addf %22, %9 : vector<64x64xf32>
    %cst_12 = arith.constant dense<0xFF800000> : vector<64xf32>
    %24 = vector.multi_reduction <maximumf>, %23, %cst_12 [1] : vector<64x64xf32> to vector<64xf32>
    %25 = vector.shape_cast %24 : vector<64xf32> to vector<64x1xf32>
    %26 = vector.broadcast %25 : vector<64x1xf32> to vector<64x64xf32>
    %27 = arith.subf %23, %26 : vector<64x64xf32>
    %28 = math.exp %27 : vector<64x64xf32>
    %cst_13 = arith.constant dense<0.000000e+00> : vector<64xf32>
    %29 = vector.multi_reduction <add>, %28, %cst_13 [1] : vector<64x64xf32> to vector<64xf32>
    %30 = vector.shape_cast %29 : vector<64xf32> to vector<64x1xf32>
    %31 = tpu.reciprocal %30 {approx = true} : vector<64x1xf32> -> vector<64x1xf32>
    %32 = vector.broadcast %31 : vector<64x1xf32> to vector<64x64xf32>
    %33 = arith.mulf %28, %32 : vector<64x64xf32>
    %34 = arith.truncf %33 : vector<64x64xf32> to vector<64x64xbf16>
    %35 = arith.truncf %8 : vector<64x128xf32> to vector<64x128xbf16>
    %cst_14 = arith.constant dense<0.000000e+00> : vector<64x128xf32>
    %36 = tpu.matmul %34, %35, %cst_14 {dimension_numbers = #tpu.dot_dimension_numbers<[1], [0], [0], [1], [0, 0, 1, 1], [], []>} : vector<64x64xbf16>, vector<64x128xbf16>, vector<64x128xf32> -> vector<64x128xf32>
    %c1 = arith.constant 1 : index
    %37 = memref.load %arg0[%c1] : memref<2xf32, #tpu.memory_space<smem>>
    %38 = arith.mulf %36, %36 : vector<64x128xf32>
    %cst_15 = arith.constant dense<0.000000e+00> : vector<64xf32>
    %39 = vector.multi_reduction <add>, %38, %cst_15 [1] : vector<64x128xf32> to vector<64xf32>
    %40 = vector.shape_cast %39 : vector<64xf32> to vector<64x1xf32>
    %cst_16 = arith.constant 1.000000e-24 : f32
    %41 = vector.broadcast %cst_16 : f32 to vector<64x1xf32>
    %42 = arith.maximumf %40, %41 : vector<64x1xf32>
    %43 = math.rsqrt %42 : vector<64x1xf32>
    %44 = vector.broadcast %43 : vector<64x1xf32> to vector<64x128xf32>
    %45 = arith.mulf %36, %44 : vector<64x128xf32>
    %46 = arith.truncf %45 : vector<64x128xf32> to vector<64x128xbf16>
    %cst_17 = arith.constant dense<0.000000e+00> : vector<64x64xf32>
    %47 = tpu.matmul %46, %46, %cst_17 {dimension_numbers = #tpu.dot_dimension_numbers<[1], [1], [0], [0], [0, 0, 1, 0], [], []>} : vector<64x128xbf16>, vector<64x128xbf16>, vector<64x64xf32> -> vector<64x64xf32>
    %48 = vector.broadcast %37 : f32 to vector<64x64xf32>
    %49 = arith.mulf %48, %47 : vector<64x64xf32>
    %50 = arith.addf %49, %9 : vector<64x64xf32>
    %cst_18 = arith.constant dense<0xFF800000> : vector<64xf32>
    %51 = vector.multi_reduction <maximumf>, %50, %cst_18 [1] : vector<64x64xf32> to vector<64xf32>
    %52 = vector.shape_cast %51 : vector<64xf32> to vector<64x1xf32>
    %53 = vector.broadcast %52 : vector<64x1xf32> to vector<64x64xf32>
    %54 = arith.subf %50, %53 : vector<64x64xf32>
    %55 = math.exp %54 : vector<64x64xf32>
    %cst_19 = arith.constant dense<0.000000e+00> : vector<64xf32>
    %56 = vector.multi_reduction <add>, %55, %cst_19 [1] : vector<64x64xf32> to vector<64xf32>
    %57 = vector.shape_cast %56 : vector<64xf32> to vector<64x1xf32>
    %58 = tpu.reciprocal %57 {approx = true} : vector<64x1xf32> -> vector<64x1xf32>
    %59 = vector.broadcast %58 : vector<64x1xf32> to vector<64x64xf32>
    %60 = arith.mulf %55, %59 : vector<64x64xf32>
    %61 = arith.truncf %60 : vector<64x64xf32> to vector<64x64xbf16>
    %62 = arith.truncf %36 : vector<64x128xf32> to vector<64x128xbf16>
    %cst_20 = arith.constant dense<0.000000e+00> : vector<64x128xf32>
    %63 = tpu.matmul %61, %62, %cst_20 {dimension_numbers = #tpu.dot_dimension_numbers<[1], [0], [0], [1], [0, 0, 1, 1], [], []>} : vector<64x64xbf16>, vector<64x128xbf16>, vector<64x128xf32> -> vector<64x128xf32>
    %64 = arith.truncf %63 : vector<64x128xf32> to vector<64x128xbf16>
    %c0_21 = arith.constant 0 : index
    %c0_22 = arith.constant 0 : index
    %65 = vector.load %arg5[%c0_21, %c0_22] : memref<128x128xbf16, #tpu.memory_space<vmem>>, vector<128x128xbf16>
    %cst_23 = arith.constant dense<0.000000e+00> : vector<64x128xf32>
    %66 = tpu.matmul %64, %65, %cst_23 {dimension_numbers = #tpu.dot_dimension_numbers<[1], [0], [0], [1], [0, 0, 1, 1], [], []>} : vector<64x128xbf16>, vector<128x128xbf16>, vector<64x128xf32> -> vector<64x128xf32>
    %c0_24 = arith.constant 0 : index
    %c0_25 = arith.constant 0 : index
    %67 = vector.load %arg6[%c0_24, %c0_25] : memref<1x128xf32, #tpu.memory_space<vmem>>, vector<1x128xf32>
    %68 = vector.broadcast %67 : vector<1x128xf32> to vector<64x128xf32>
    %69 = arith.addf %66, %68 : vector<64x128xf32>
    %70 = tpu.iota {dimensions = array<i32: 1>} : vector<64x128xi32>
    %c8_i32 = arith.constant 8 : i32
    %71 = vector.broadcast %c8_i32 : i32 to vector<64x128xi32>
    %72 = arith.cmpi slt, %70, %71 : vector<64x128xi32>
    %cst_26 = arith.constant -1.000000e+30 : f32
    %73 = vector.broadcast %cst_26 : f32 to vector<64x128xf32>
    %74 = arith.select %72, %69, %73 : vector<64x128xi1>, vector<64x128xf32>
    %cst_27 = arith.constant dense<0xFF800000> : vector<64xf32>
    %75 = vector.multi_reduction <maximumf>, %74, %cst_27 [1] : vector<64x128xf32> to vector<64xf32>
    %76 = vector.shape_cast %75 : vector<64xf32> to vector<64x1xf32>
    %77 = vector.broadcast %76 : vector<64x1xf32> to vector<64x128xf32>
    %78 = arith.subf %74, %77 : vector<64x128xf32>
    %79 = math.exp %78 : vector<64x128xf32>
    %cst_28 = arith.constant dense<0.000000e+00> : vector<64xf32>
    %80 = vector.multi_reduction <add>, %79, %cst_28 [1] : vector<64x128xf32> to vector<64xf32>
    %81 = vector.shape_cast %80 : vector<64xf32> to vector<64x1xf32>
    %82 = math.log %81 : vector<64x1xf32>
    %83 = vector.broadcast %76 : vector<64x1xf32> to vector<64x128xf32>
    %84 = arith.subf %74, %83 : vector<64x128xf32>
    %85 = vector.broadcast %82 : vector<64x1xf32> to vector<64x128xf32>
    %86 = arith.subf %84, %85 : vector<64x128xf32>
    %c0_29 = arith.constant 0 : index
    %c0_30 = arith.constant 0 : index
    %87 = vector.load %arg7[%c0_29, %c0_30] : memref<64x128xf32, #tpu.memory_space<vmem>>, vector<64x128xf32>
    tpu.vector_store %arg7[%c0_29, %c0_30], %86 {strides = array<i32>} : memref<64x128xf32, #tpu.memory_space<vmem>>, vector<64x128xf32>,
    return
  }
}

</mosaic_0001>

<bundles_post_ra>
// kernel: net_forward.1
= control target key start
LH: loop header
LB: loop body
LE: loop exit
PB: predicated region body
PF: predicated region fallthrough
CT: control target
= control target key end

     0   :  { %12 = vsyncpa [#allocation3], 0  ;;  %s1698_s0 = inlined_call_operand.vmem [shape: f32[2], index: 0, kind: input, shape index: {}]   ;;  %s1699_s1 = inlined_call_operand.vmem [shape: f32[64,32], index: 1, kind: input, shape index: {}]   ;;  %s1700_s2 = inlined_call_operand.vmem [shape: bf16[32,128], index: 2, kind: input, shape index: {}]   ;;  %s1701_s3 = inlined_call_operand.vmem [shape: f32[1,128], index: 3, kind: input, shape index: {}]   ;;  %s1702_s4 = inlined_call_operand.vmem [shape: f32[64,64], index: 4, kind: input, shape index: {}]   ;;  %s1703_s5 = inlined_call_operand.vmem [shape: bf16[128,128], index: 5, kind: input, shape index: {}]   ;;  %s1704_s6 = inlined_call_operand.vmem [shape: f32[1,128], index: 6, kind: input, shape index: {}]   ;;  %s1705_s7 = inlined_call_operand.vmem [shape: f32[64,128], index: 7, kind: output, shape index: {}]  }
   0x1   :  { %s19_s26 = sshll.u32 %s1698_s0, 4  ;;  %s20_s26 = int_to_ptr.vmem [resolvable:$true] %s19_s26 }
   0x2   :  { %s1344_s27 = scalar_lea.vmem %s20_s26, 16  ;;  %p1349_p1 = scmp.lt.s32.totalorder %s20_s26, %s20_s26 }
   0x3   :  { %p1345_p0 = scmp.ne.s32.totalorder %s20_s26, %s1344_s27  ;;  %p1350_p2 = scmp.lt.s32.totalorder %s1344_s27, %s1344_s27 }
   0x5   :  { %p1351_p3 = por %p1350_p2, %p1349_p1 }
   0x7   :  { %p1352_p4 = pnand %p1351_p3, %p1345_p0 }
   0x9   :  { %1355 = shalt.err (!%p1352_p4)
}
   0xa   :  { %s1358_s28 = smov [#allocation2]  }
   0xb   :  { %22 = dma.vmem_to_smem %s20_s26, 16, %s1358_s28, [#allocation3]  }
   0xc   :  { %1356 = dma.done.wait [#allocation3], 16  }
   0xd   :  { %1357 = vsyncadd [#allocation3], 4294967280 }
   0xe   :  { %38 = sfence }
   0xf   :  { %v1206_v0 = vld [vmem:[%s1700_s2] sm:$0xff]   ;;  %v1207_v1 = vld [vmem:[%s1700_s2 + $0x8] sm:$0xff]   ;;  %vm75_vm0 = vcmask 261120   ;;  %v42_v5 = vld [vmem:[%s1699_s1 + $0x10] sm:$0xff]  ;;  %vm304_vm1 = vcmask 523264  }
  0x10   :  { %1105 = vmatprep.subr.bf16.mxu0 %v1206_v0  ;;  %v40_v2 = vld [vmem:[%s1699_s1] sm:$0xff]  ;;  %v41_v3 = vld [vmem:[%s1699_s1 + $0x8] sm:$0xff]  ;;  %v43_v6 = vld [vmem:[%s1699_s1 + $0x18] sm:$0xff] }
  0x11   :  { %1106 = vmatpush3.bf16.msra.mxu0 %v1206_v0  ;;  %v48_v4 = vpack.c.bf16 %v41_v3, %v40_v2  ;;  %v44_v7 = vld [vmem:[%s1699_s1 + $0x20] sm:$0xff]  ;;  %v45_v8 = vld [vmem:[%s1699_s1 + $0x28] sm:$0xff]  ;;  %v49_v9 = vpack.c.bf16 %v43_v6, %v42_v5  ;;  %v46_v11 = vld [vmem:[%s1699_s1 + $0x30] sm:$0xff] }
  0x12   :  { %1107 = vmatprep.subr.bf16.mxu0 %v1207_v1  ;;  %v50_v10 = vpack.c.bf16 %v45_v8, %v44_v7  ;;  %v47_v12 = vld [vmem:[%s1699_s1 + $0x38] sm:$0xff]  ;;  %v1030_v14 = vld [vmem:[%s1701_s3] ss:$0 sm:$0xff]  ;;  %s169_s1 = sld [smem:[#allocation2]] }
  0x13   :  { %1109 = vmatprep.mubr.msk.bf16.mxu0 %vm75_vm0, %v48_v4  ;;  %v51_v13 = vpack.c.bf16 %v47_v12, %v46_v11 }
  0x15   :  { %1108 = vmatpush3.bf16.msra.mxu0 %v1207_v1 }
  0x18   :  { %1110 = vmatmul.mubr.msk.bf16.vlgmr.msra.gmra.mrb[0].mxu0 %vm75_vm0, %v49_v9 }
  0x19   :  { %1113 = vmatprep.mubr.msk.bf16.mxu0 %vm75_vm0, %v50_v10 }
  0x20   :  { %1114 = vmatmul.mubr.msk.bf16.gmra.mrb[4].mxu0 %vm75_vm0, %v51_v13 }
  0xeb   :  { %v1111_v15 = vpop.f32.mrb[0].mxu0 }
  0xec   :  { %v131_v16 = vadd.f32 %v1111_v15, %v1030_v14  ;;  %v122_v17 = vpop.f32.mrb[1].mxu0 }
  0xed   :  { %v123_v18 = vadd.f32 %v1030_v14, %v122_v17  ;;  %v1112_v19 = vpop.f32.mrb[2].mxu0 }
  0xee   :  { %v1439_v20 = vmax.f32 %v131_v16, 0.0  ;;  %v134_v21 = vadd.f32 %v1112_v19, %v1030_v14  ;;  %v125_v22 = vpop.f32.mrb[3].mxu0 }
  0xef   :  { %v1441_v23 = vmax.f32 %v123_v18, 0.0  ;;  %v126_v24 = vadd.f32 %v1030_v14, %v125_v22 }
  0xf0   :  { %v1443_v25 = vmax.f32 %v134_v21, 0.0  ;;  %v172_v26 = vmul.f32 %v1439_v20, %v1439_v20 }
  0xf1   :  { %v1447_v27 = vmax.f32 %v126_v24, 0.0  ;;  %v170_v28 = vmul.f32 %v1441_v23, %v1441_v23 }
  0xf2   :  { %182 = vadd.xlane.f32.xlu1 %v172_v26  ;;  %v173_v33 = vmul.f32 %v1443_v25, %v1443_v25  ;;  %v398_v36 = vpack.c.bf16 %v1443_v25, %v1439_v20  ;;  %v1478_v26 = vld [vmem:[%s1702_s4] sm:$0xff] }
  0xf3   :  { %v1115_v29 = vpop.f32.mrb[4].mxu0  ;;  %178 = vadd.xlane.f32.xlu0 %v170_v28  ;;  %v397_v30 = vpack.c.bf16 %v1447_v27, %v1441_v23  ;;  %v171_v37 = vmul.f32 %v1447_v27, %v1447_v27 }
  0xf4   :  { %v147_v31 = vadd.f32 %v1115_v29, %v1030_v14  ;;  %v138_v32 = vpop.f32.mrb[5].mxu0 }
  0xf5   :  { %v139_v34 = vadd.f32 %v1030_v14, %v138_v32  ;;  %v1116_v35 = vpop.f32.mrb[6].mxu0  ;;  %1133 = vmatprep.subr.bf16.mxu0 %v397_v30  ;;  %v1488_v32 = vld [vmem:[%s1702_s4 + $0x10] sm:$0xff] }
  0xf6   :  { %v150_v38 = vadd.f32 %v1116_v35, %v1030_v14  ;;  %184 = vadd.xlane.f32.xlu1 %v173_v33  ;;  %v141_v39 = vpop.f32.mrb[7].mxu0  ;;  %1134 = vmatpush3.bf16.msra.mxu0 %v397_v30  ;;  %v1459_v40 = vmax.f32 %v147_v31, 0.0  ;;  %v1483_v31 = vld [vmem:[%s1702_s4 + $0x8] sm:$0xff] }
  0xf7   :  { %v157_v41 = vmax.f32 %v139_v34, 0.0  ;;  %v142_v42 = vadd.f32 %v1030_v14, %v141_v39  ;;  %1135 = vmatprep.subr.bf16.mxu0 %v398_v36  ;;  %180 = vadd.xlane.f32.xlu0 %v171_v37 }
  0xf8   :  { %v1461_v43 = vmax.f32 %v150_v38, 0.0  ;;  %v176_v48 = vmul.f32 %v1459_v40, %v1459_v40 }
  0xf9   :  { %v158_v44 = vmax.f32 %v142_v42, 0.0  ;;  %v174_v45 = vmul.f32 %v157_v41, %v157_v41 }
  0xfa   :  { %1136 = vmatpush3.bf16.msra.mxu0 %v398_v36  ;;  %v400_v49 = vpack.c.bf16 %v1461_v43, %v1459_v40  ;;  %v177_v50 = vmul.f32 %v1461_v43, %v1461_v43  ;;  %v1494_v36 = vld [vmem:[%s1702_s4 + $0x18] sm:$0xff] }
  0xfb   :  { %186 = vadd.xlane.f32.xlu0 %v174_v45  ;;  %v175_v46 = vmul.f32 %v158_v44, %v158_v44  ;;  %v399_v47 = vpack.c.bf16 %v158_v44, %v157_v41 }
  0xfd   :  { %188 = vadd.xlane.f32.xlu1 %v175_v46  ;;  %1137 = vmatprep.subr.bf16.mxu0 %v399_v47 }
  0xfe   :  { %1138 = vmatpush3.bf16.msra.mxu0 %v399_v47 }
  0xff   :  { %190 = vadd.xlane.f32.xlu0 %v176_v48  ;;  %1139 = vmatprep.subr.bf16.mxu0 %v400_v49 }
 0x101   :  { %192 = vadd.xlane.f32.xlu1 %v177_v50  ;;  %v1510_v50 = vld [vmem:[%s1702_s4 + $0x28] sm:$0xff] }
 0x102   :  { %1140 = vmatpush3.bf16.msra.mxu0 %v400_v49 }
 0x17f   :  { %v183_v51 = vpop.xlane.xlu1 %182 }
 0x180   :  { %v196_v52 = vmax.f32 %v183_v51, 1e-24  ;;  %v179_v53 = vpop.xlane.xlu0 %178  ;;  %v1515_v51 = vld [vmem:[%s1702_s4 + $0x30] sm:$0xff] }
 0x181   :  { %v194_v54 = vmax.f32 %v179_v53, 1e-24 }
 0x182   :  { %1216 = vrsqrt.f32 %v196_v52 }
 0x183   :  { %v185_v55 = vpop.xlane.xlu1 %184  ;;  %1218 = vrsqrt.f32 %v194_v54 }
 0x184   :  { %v197_v56 = vmax.f32 %v185_v55, 1e-24  ;;  %v181_v57 = vpop.xlane.xlu0 %180 }
 0x185   :  { %v195_v58 = vmax.f32 %v181_v57, 1e-24 }
 0x186   :  { %1220 = vrsqrt.f32 %v197_v56  ;;  %v1522_v56 = vld [vmem:[%s1702_s4 + $0x38] sm:$0xff] }
 0x187   :  { %1222 = vrsqrt.f32 %v195_v58 }
 0x188   :  { %v187_v59 = vpop.xlane.xlu0 %186 }
 0x189   :  { %v198_v61 = vmax.f32 %v187_v59, 1e-24 }
 0x18a   :  { %v189_v60 = vpop.xlane.xlu1 %188 }
 0x18b   :  { %v199_v62 = vmax.f32 %v189_v60, 1e-24 }
 0x18c   :  { %v1217_v63 = vpop.eup %1216  ;;  %v191_v3 = vpop.xlane.xlu0 %190 }
 0x18d   :  { %1224 = vrsqrt.f32 %v199_v62  ;;  %v1219_v1 = vpop.eup %1218  ;;  %v200_v9 = vmax.f32 %v191_v3, 1e-24  ;;  %v212_v11 = vmul.f32 %v1217_v63, %v1439_v20 }
 0x18e   :  { %v193_v0 = vpop.xlane.xlu1 %192  ;;  %1226 = vrsqrt.f32 %v198_v61  ;;  %v210_v6 = vmul.f32 %v1219_v1, %v1441_v23  ;;  %v287_v23 = vstv %s169_s1 }
 0x18f   :  { %v201_v5 = vmax.f32 %v193_v0, 1e-24 }
 0x190   :  { %v1221_v2 = vpop.eup %1220 }
 0x191   :  { %v1223_v4 = vpop.eup %1222  ;;  %v213_v8 = vmul.f32 %v1221_v2, %v1443_v25  ;;  %1228 = vrsqrt.f32 %v201_v5 }
 0x192   :  { %v211_v7 = vmul.f32 %v1223_v4, %v1447_v27  ;;  %1230 = vrsqrt.f32 %v200_v9 }
 0x193   :  { %v219_v12 = vpack.c.bf16 %v213_v8, %v212_v11 }
 0x194   :  { %v218_v10 = vpack.c.bf16 %v211_v7, %v210_v6 }
 0x196   :  { %1117 = vmatprep.subr.bf16.mxu1 %v218_v10  ;;  %1125 = vmatprep.mubr.bf16.mxu1 %v218_v10 }
 0x197   :  { %v1225_v13 = vpop.eup %1224  ;;  %1118 = vmatpush3.bf16.xpose.msra.mxu1 %v218_v10 }
 0x198   :  { %1119 = vmatprep.subr.bf16.mxu1 %v219_v12  ;;  %v1227_v14 = vpop.eup %1226  ;;  %v215_v15 = vmul.f32 %v1225_v13, %v158_v44  ;;  %v1504_v44 = vld [vmem:[%s1702_s4 + $0x20] sm:$0xff]  ;;  %s1041_s4 = sld [smem:[#allocation2 + $0x1]] }
 0x199   :  { %v214_v16 = vmul.f32 %v1227_v14, %v157_v41 }
 0x19b   :  { %v220_v17 = vpack.c.bf16 %v215_v15, %v214_v16  ;;  %v1229_v18 = vpop.eup %1228 }
 0x19c   :  { %v1231_v19 = vpop.eup %1230  ;;  %v217_v21 = vmul.f32 %v1229_v18, %v1461_v43 }
 0x19d   :  { %v216_v20 = vmul.f32 %v1231_v19, %v1459_v40 }
 0x19f   :  { %1120 = vmatpush3.bf16.xpose.msra.mxu1 %v219_v12  ;;  %v221_v22 = vpack.c.bf16 %v217_v21, %v216_v20 }
 0x1a0   :  { %1121 = vmatprep.subr.bf16.mxu1 %v220_v17 }
 0x1a7   :  { %1122 = vmatpush3.bf16.xpose.msra.mxu1 %v220_v17 }
 0x1a8   :  { %1123 = vmatprep.subr.bf16.mxu1 %v221_v22 }
 0x1af   :  { %1124 = vmatpush3.bf16.xpose.msra.mxu1 %v221_v22 }
 0x1b6   :  { %1126 = vmatmul.mubr.bf16.vlgmr.msra.gmra.mrb[0].mxu1 %v219_v12 }
 0x1b7   :  { %1129 = vmatprep.mubr.bf16.mxu1 %v220_v17 }
 0x1be   :  { %1130 = vmatmul.mubr.bf16.gmra.mrb[4].mxu1 %v221_v22 }
 0x289   :  { %v1127_v24 = vpop.f32.mrb[0].mxu1 }
 0x28a   :  { %v256_v25 = vpop.f32.mrb[1].mxu1  ;;  %v290_v27 = vmul.f32 %v1127_v24, %v287_v23 }
 0x28b   :  { %v288_v28 = vmul.f32 %v287_v23, %v256_v25  ;;  %v1128_v29 = vpop.f32.mrb[2].mxu1 }
 0x28c   :  { %v259_v30 = vpop.f32.mrb[3].mxu1  ;;  %v291_v33 = vmul.f32 %v1128_v29, %v287_v23  ;;  %v298_v39 = vadd.f32 %v290_v27, %v1488_v32 }
 0x28d   :  { %v289_v34 = vmul.f32 %v287_v23, %v259_v30  ;;  %v296_v35 = vadd.f32 %v288_v28, %v1478_v26 }
 0x28e   :  { %v299_v42 = vadd.f32 %v291_v33, %v1494_v36  ;;  %v311_v48 = vsel %vm304_vm1, %v298_v39, -inf }
 0x28f   :  { %v305_v37 = vsel %vm304_vm1, %v296_v35, -inf  ;;  %v297_v38 = vadd.f32 %v289_v34, %v1483_v31 }
 0x290   :  { %306 = vmax.xlane.f32.xlu0 %v305_v37  ;;  %v314_v54 = vsel %vm304_vm1, %v299_v42, -inf }
 0x291   :  { %v1131_v40 = vpop.f32.mrb[4].mxu1  ;;  %v308_v41 = vsel %vm304_vm1, %v297_v38, -inf }
 0x292   :  { %309 = vmax.xlane.f32.xlu1 %v308_v41  ;;  %v272_v43 = vpop.f32.mrb[5].mxu1  ;;  %v294_v45 = vmul.f32 %v1131_v40, %v287_v23 }
 0x293   :  { %v292_v46 = vmul.f32 %v287_v23, %v272_v43  ;;  %v1132_v47 = vpop.f32.mrb[6].mxu1 }
 0x294   :  { %312 = vmax.xlane.f32.xlu0 %v311_v48  ;;  %v275_v49 = vpop.f32.mrb[7].mxu1  ;;  %v295_v52 = vmul.f32 %v1132_v47, %v287_v23  ;;  %v302_v59 = vadd.f32 %v294_v45, %v1515_v51 }
 0x295   :  { %v293_v53 = vmul.f32 %v287_v23, %v275_v49  ;;  %v300_v55 = vadd.f32 %v292_v46, %v1504_v44 }
 0x296   :  { %315 = vmax.xlane.f32.xlu1 %v314_v54  ;;  %v303_v61 = vadd.f32 %v295_v52, %v1522_v56  ;;  %v323_v62 = vsel %vm304_vm1, %v302_v59, -inf }
 0x297   :  { %v317_v57 = vsel %vm304_vm1, %v300_v55, -inf  ;;  %v301_v58 = vadd.f32 %v293_v53, %v1510_v50 }
 0x298   :  { %318 = vmax.xlane.f32.xlu0 %v317_v57  ;;  %v326_v63 = vsel %vm304_vm1, %v303_v61, -inf }
 0x299   :  { %v320_v60 = vsel %vm304_vm1, %v301_v58, -inf }
 0x29a   :  { %321 = vmax.xlane.f32.xlu1 %v320_v60 }
 0x29c   :  { %324 = vmax.xlane.f32.xlu0 %v323_v62 }
 0x29e   :  { %327 = vmax.xlane.f32.xlu1 %v326_v63 }
 0x31d   :  { %v307_v0 = vpop.xlane.xlu0 %306 }
 0x31e   :  { %v329_v1 = vsub.f32 %v296_v35, %v307_v0 }
 0x31f   :  { %v310_v2 = vpop.xlane.xlu1 %309 }
 0x320   :  { %v337_v3 = vmul.f32 1.442695, %v329_v1  ;;  %v330_v4 = vsub.f32 %v297_v38, %v310_v2 }
 0x321   :  { %v313_v5 = vpop.xlane.xlu0 %312 }
 0x322   :  { %1232 = vpow2.f32 %v337_v3  ;;  %v339_v6 = vmul.f32 1.442695, %v330_v4  ;;  %v331_v7 = vsub.f32 %v298_v39, %v313_v5 }
 0x323   :  { %v316_v8 = vpop.xlane.xlu1 %315 }
 0x324   :  { %1234 = vpow2.f32 %v339_v6  ;;  %v341_v9 = vmul.f32 1.442695, %v331_v7  ;;  %v332_v10 = vsub.f32 %v299_v42, %v316_v8 }
 0x325   :  { %v319_v11 = vpop.xlane.xlu0 %318 }
 0x326   :  { %1236 = vpow2.f32 %v341_v9  ;;  %v343_v12 = vmul.f32 1.442695, %v332_v10  ;;  %v333_v13 = vsub.f32 %v300_v55, %v319_v11 }
 0x327   :  { %v322_v14 = vpop.xlane.xlu1 %321 }
 0x328   :  { %1238 = vpow2.f32 %v343_v12  ;;  %v345_v15 = vmul.f32 1.442695, %v333_v13  ;;  %v334_v16 = vsub.f32 %v301_v58, %v322_v14 }
 0x329   :  { %v325_v17 = vpop.xlane.xlu0 %324 }
 0x32a   :  { %1240 = vpow2.f32 %v345_v15  ;;  %v347_v18 = vmul.f32 1.442695, %v334_v16  ;;  %v335_v19 = vsub.f32 %v302_v59, %v325_v17 }
 0x32b   :  { %v328_v21 = vpop.xlane.xlu1 %327 }
 0x32c   :  { %v1233_v20 = vpop.eup %1232  ;;  %1242 = vpow2.f32 %v347_v18  ;;  %v349_v22 = vmul.f32 1.442695, %v335_v19  ;;  %v336_v23 = vsub.f32 %v303_v61, %v328_v21 }
 0x32d   :  { %v353_v24 = vsel %vm304_vm1, %v1233_v20, 0.0 }
 0x32e   :  { %v1235_v25 = vpop.eup %1234  ;;  %1244 = vpow2.f32 %v349_v22  ;;  %v351_v27 = vmul.f32 1.442695, %v336_v23  ;;  %354 = vadd.xlane.f32.xlu0 %v353_v24 }
 0x32f   :  { %v356_v28 = vsel %vm304_vm1, %v1235_v25, 0.0 }
 0x330   :  { %v1237_v29 = vpop.eup %1236  ;;  %1246 = vpow2.f32 %v351_v27  ;;  %357 = vadd.xlane.f32.xlu1 %v356_v28 }
 0x331   :  { %v359_v30 = vsel %vm304_vm1, %v1237_v29, 0.0 }
 0x332   :  { %v1239_v33 = vpop.eup %1238  ;;  %360 = vadd.xlane.f32.xlu0 %v359_v30 }
 0x333   :  { %v362_v34 = vsel %vm304_vm1, %v1239_v33, 0.0 }
 0x334   :  { %v1241_v35 = vpop.eup %1240  ;;  %363 = vadd.xlane.f32.xlu1 %v362_v34 }
 0x335   :  { %v365_v37 = vsel %vm304_vm1, %v1241_v35, 0.0 }
 0x336   :  { %v1243_v38 = vpop.eup %1242  ;;  %366 = vadd.xlane.f32.xlu0 %v365_v37 }
 0x337   :  { %v368_v39 = vsel %vm304_vm1, %v1243_v38, 0.0 }
 0x338   :  { %v1245_v40 = vpop.eup %1244  ;;  %369 = vadd.xlane.f32.xlu1 %v368_v39 }
 0x339   :  { %v371_v41 = vsel %vm304_vm1, %v1245_v40, 0.0 }
 0x33a   :  { %v1247_v42 = vpop.eup %1246  ;;  %372 = vadd.xlane.f32.xlu0 %v371_v41 }
 0x33b   :  { %v374_v43 = vsel %vm304_vm1, %v1247_v42, 0.0 }
 0x33c   :  { %375 = vadd.xlane.f32.xlu1 %v374_v43 }
 0x3bb   :  { %v355_v45 = vpop.xlane.xlu0 %354 }
 0x3bc   :  { %1248 = vrcp.f32 %v355_v45 }
 0x3bd   :  { %v358_v46 = vpop.xlane.xlu1 %357 }
 0x3be   :  { %1250 = vrcp.f32 %v358_v46 }
 0x3bf   :  { %v361_v47 = vpop.xlane.xlu0 %360 }
 0x3c0   :  { %1252 = vrcp.f32 %v361_v47 }
 0x3c1   :  { %v364_v48 = vpop.xlane.xlu1 %363 }
 0x3c2   :  { %1254 = vrcp.f32 %v364_v48 }
 0x3c3   :  { %v367_v49 = vpop.xlane.xlu0 %366 }
 0x3c4   :  { %1256 = vrcp.f32 %v367_v49 }
 0x3c5   :  { %v370_v52 = vpop.xlane.xlu1 %369 }
 0x3c6   :  { %v1249_v53 = vpop.eup %1248  ;;  %1258 = vrcp.f32 %v370_v52 }
 0x3c7   :  { %v373_v54 = vpop.xlane.xlu0 %372  ;;  %v385_v58 = vmul.f32 %v1249_v53, %v1233_v20 }
 0x3c8   :  { %v1251_v55 = vpop.eup %1250  ;;  %1260 = vrcp.f32 %v373_v54 }
 0x3c9   :  { %v376_v57 = vpop.xlane.xlu1 %375  ;;  %v386_v59 = vmul.f32 %v1251_v55, %v1235_v25 }
 0x3ca   :  { %v1253_v60 = vpop.eup %1252  ;;  %1262 = vrcp.f32 %v376_v57 }
 0x3cb   :  { %v393_v61 = vpack.c.bf16 %v386_v59, %v385_v58  ;;  %v387_v63 = vmul.f32 %v1253_v60, %v1237_v29 }
 0x3cc   :  { %v1255_v62 = vpop.eup %1254 }
 0x3cd   :  { %v388_v0 = vmul.f32 %v1255_v62, %v1239_v33  ;;  %1141 = vmatprep.mubr.msk.bf16.mxu0 %vm304_vm1, %v393_v61 }
 0x3ce   :  { %v1257_v1 = vpop.eup %1256 }
 0x3cf   :  { %v394_v2 = vpack.c.bf16 %v388_v0, %v387_v63  ;;  %v389_v4 = vmul.f32 %v1257_v1, %v1241_v35 }
 0x3d0   :  { %v1259_v3 = vpop.eup %1258 }
 0x3d1   :  { %1142 = vmatmul.mubr.msk.bf16.vlgmr.msra.gmra.mrb[8].mxu0 %vm304_vm1, %v394_v2  ;;  %v390_v5 = vmul.f32 %v1259_v3, %v1243_v38 }
 0x3d2   :  { %v1261_v6 = vpop.eup %1260 }
 0x3d3   :  { %v395_v7 = vpack.c.bf16 %v390_v5, %v389_v4  ;;  %v391_v9 = vmul.f32 %v1261_v6, %v1245_v40 }
 0x3d4   :  { %v1263_v8 = vpop.eup %1262 }
 0x3d5   :  { %1145 = vmatprep.mubr.msk.bf16.mxu0 %vm304_vm1, %v395_v7  ;;  %v392_v10 = vmul.f32 %v1263_v8, %v1247_v42 }
 0x3d7   :  { %v396_v11 = vpack.c.bf16 %v392_v10, %v391_v9 }
 0x3d9   :  { %1146 = vmatmul.mubr.msk.bf16.gmra.mrb[12].mxu0 %vm304_vm1, %v396_v11 }
 0x4a4   :  { %v1143_v12 = vpop.f32.mrb[8].mxu0 }
 0x4a5   :  { %v447_v13 = vpop.f32.mrb[9].mxu0  ;;  %v481_v21 = vmul.f32 %v1143_v12, %v1143_v12 }
 0x4a6   :  { %v1144_v14 = vpop.f32.mrb[10].mxu0  ;;  %v479_v15 = vmul.f32 %v447_v13, %v447_v13 }
 0x4a7   :  { %v1543_v16 = vpack.c.bf16 %v1144_v14, %v1143_v12  ;;  %v450_v17 = vpop.f32.mrb[11].mxu0  ;;  %v482_v22 = vmul.f32 %v1144_v14, %v1144_v14 }
 0x4a8   :  { %v1545_v18 = vpack.c.bf16 %v450_v17, %v447_v13  ;;  %487 = vadd.xlane.f32.xlu0 %v479_v15  ;;  %v480_v19 = vmul.f32 %v450_v17, %v450_v17 }
 0x4aa   :  { %489 = vadd.xlane.f32.xlu1 %v480_v19 }
 0x4ac   :  { %491 = vadd.xlane.f32.xlu0 %v481_v21  ;;  %v1147_v20 = vpop.f32.mrb[12].mxu0 }
 0x4ad   :  { %v463_v23 = vpop.f32.mrb[13].mxu0  ;;  %v485_v33 = vmul.f32 %v1147_v20, %v1147_v20 }
 0x4ae   :  { %493 = vadd.xlane.f32.xlu1 %v482_v22  ;;  %v1148_v24 = vpop.f32.mrb[14].mxu0  ;;  %v483_v25 = vmul.f32 %v463_v23, %v463_v23 }
 0x4af   :  { %v1547_v27 = vpack.c.bf16 %v1148_v24, %v1147_v20  ;;  %v466_v28 = vpop.f32.mrb[15].mxu0  ;;  %v486_v34 = vmul.f32 %v1148_v24, %v1148_v24 }
 0x4b0   :  { %v1549_v29 = vpack.c.bf16 %v466_v28, %v463_v23  ;;  %495 = vadd.xlane.f32.xlu0 %v483_v25  ;;  %v484_v30 = vmul.f32 %v466_v28, %v466_v28 }
 0x4b2   :  { %497 = vadd.xlane.f32.xlu1 %v484_v30 }
 0x4b4   :  { %499 = vadd.xlane.f32.xlu0 %v485_v33 }
 0x4b6   :  { %501 = vadd.xlane.f32.xlu1 %v486_v34 }
 0x535   :  { %v488_v35 = vpop.xlane.xlu0 %487 }
 0x536   :  { %v503_v37 = vmax.f32 %v488_v35, 1e-24 }
 0x537   :  { %v490_v38 = vpop.xlane.xlu1 %489 }
 0x538   :  { %1264 = vrsqrt.f32 %v503_v37  ;;  %v504_v39 = vmax.f32 %v490_v38, 1e-24 }
 0x539   :  { %v492_v40 = vpop.xlane.xlu0 %491 }
 0x53a   :  { %1266 = vrsqrt.f32 %v504_v39  ;;  %v505_v41 = vmax.f32 %v492_v40, 1e-24 }
 0x53b   :  { %v494_v42 = vpop.xlane.xlu1 %493 }
 0x53c   :  { %1268 = vrsqrt.f32 %v505_v41  ;;  %v506_v43 = vmax.f32 %v494_v42, 1e-24 }
 0x53d   :  { %v496_v45 = vpop.xlane.xlu0 %495 }
 0x53e   :  { %1270 = vrsqrt.f32 %v506_v43  ;;  %v507_v46 = vmax.f32 %v496_v45, 1e-24 }
 0x53f   :  { %v498_v47 = vpop.xlane.xlu1 %497 }
 0x540   :  { %1272 = vrsqrt.f32 %v507_v46  ;;  %v508_v48 = vmax.f32 %v498_v47, 1e-24 }
 0x541   :  { %v500_v49 = vpop.xlane.xlu0 %499 }
 0x542   :  { %v1265_v52 = vpop.eup %1264  ;;  %1274 = vrsqrt.f32 %v508_v48  ;;  %v509_v53 = vmax.f32 %v500_v49, 1e-24 }
 0x543   :  { %v502_v54 = vpop.xlane.xlu1 %501  ;;  %v519_v58 = vmul.f32 %v1265_v52, %v447_v13 }
 0x544   :  { %v1267_v55 = vpop.eup %1266  ;;  %1276 = vrsqrt.f32 %v509_v53  ;;  %v510_v57 = vmax.f32 %v502_v54, 1e-24 }
 0x545   :  { %v520_v59 = vmul.f32 %v1267_v55, %v450_v17 }
 0x546   :  { %v1269_v60 = vpop.eup %1268  ;;  %1278 = vrsqrt.f32 %v510_v57 }
 0x547   :  { %v527_v61 = vpack.c.bf16 %v520_v59, %v519_v58  ;;  %v521_v63 = vmul.f32 %v1269_v60, %v1143_v12  ;;  %v596_v12 = vstv %s1041_s4 }
 0x548   :  { %v1271_v62 = vpop.eup %1270 }
 0x549   :  { %1149 = vmatprep.subr.bf16.mxu0 %v527_v61  ;;  %1157 = vmatprep.mubr.bf16.mxu0 %v527_v61  ;;  %v522_v0 = vmul.f32 %v1271_v62, %v1144_v14 }
 0x54a   :  { %v1273_v1 = vpop.eup %1272  ;;  %1150 = vmatpush3.bf16.xpose.msra.mxu0 %v527_v61 }
 0x54b   :  { %v528_v2 = vpack.c.bf16 %v522_v0, %v521_v63  ;;  %v523_v4 = vmul.f32 %v1273_v1, %v463_v23 }
 0x54c   :  { %v1275_v3 = vpop.eup %1274 }
 0x54d   :  { %1151 = vmatprep.subr.bf16.mxu0 %v528_v2  ;;  %v524_v5 = vmul.f32 %v1275_v3, %v466_v28 }
 0x54e   :  { %v1277_v6 = vpop.eup %1276 }
 0x54f   :  { %v529_v7 = vpack.c.bf16 %v524_v5, %v523_v4  ;;  %v525_v9 = vmul.f32 %v1277_v6, %v1147_v20 }
 0x550   :  { %v1279_v8 = vpop.eup %1278 }
 0x551   :  { %v526_v10 = vmul.f32 %v1279_v8, %v1148_v24 }
 0x552   :  { %1152 = vmatpush3.bf16.xpose.msra.mxu0 %v528_v2 }
 0x553   :  { %1153 = vmatprep.subr.bf16.mxu0 %v529_v7  ;;  %v530_v11 = vpack.c.bf16 %v526_v10, %v525_v9 }
 0x55a   :  { %1154 = vmatpush3.bf16.xpose.msra.mxu0 %v529_v7 }
 0x55b   :  { %1155 = vmatprep.subr.bf16.mxu0 %v530_v11 }
 0x562   :  { %1156 = vmatpush3.bf16.xpose.msra.mxu0 %v530_v11 }
 0x563   :  { %1165 = vmatprep.subr.bf16.mxu0 %v1545_v18 }
 0x569   :  { %1158 = vmatmul.mubr.bf16.vlgmr.msra.gmra.mrb[16].mxu0 %v528_v2 }
 0x56a   :  { %1161 = vmatprep.mubr.bf16.mxu0 %v529_v7  ;;  %1166 = vmatpush3.bf16.msra.mxu0 %v1545_v18 }
 0x56b   :  { %1167 = vmatprep.subr.bf16.mxu0 %v1543_v16 }
 0x56e   :  { %1168 = vmatpush3.bf16.msra.mxu0 %v1543_v16 }
 0x56f   :  { %1169 = vmatprep.subr.bf16.mxu0 %v1549_v29 }
 0x571   :  { %1162 = vmatmul.mubr.bf16.gmra.mrb[20].mxu0 %v530_v11 }
 0x572   :  { %1170 = vmatpush3.bf16.msra.mxu0 %v1549_v29 }
 0x573   :  { %1171 = vmatprep.subr.bf16.mxu0 %v1547_v27 }
 0x576   :  { %1172 = vmatpush3.bf16.msra.mxu0 %v1547_v27 }
 0x63c   :  { %v1159_v13 = vpop.f32.mrb[16].mxu0 }
 0x63d   :  { %v565_v14 = vpop.f32.mrb[17].mxu0  ;;  %v599_v15 = vmul.f32 %v1159_v13, %v596_v12 }
 0x63e   :  { %v597_v17 = vmul.f32 %v596_v12, %v565_v14  ;;  %v1160_v18 = vpop.f32.mrb[18].mxu0 }
 0x63f   :  { %v568_v19 = vpop.f32.mrb[19].mxu0  ;;  %v600_v21 = vmul.f32 %v1160_v18, %v596_v12  ;;  %v607_v24 = vadd.f32 %v599_v15, %v1488_v32 }
 0x640   :  { %v598_v20 = vmul.f32 %v596_v12, %v568_v19  ;;  %v605_v16 = vadd.f32 %v597_v17, %v1478_v26 }
 0x641   :  { %v608_v28 = vadd.f32 %v600_v21, %v1494_v36  ;;  %v619_v35 = vsel %vm304_vm1, %v607_v24, -inf }
 0x642   :  { %v613_v22 = vsel %vm304_vm1, %v605_v16, -inf  ;;  %v606_v23 = vadd.f32 %v598_v20, %v1483_v31 }
 0x643   :  { %614 = vmax.xlane.f32.xlu0 %v613_v22  ;;  %v622_v31 = vsel %vm304_vm1, %v608_v28, -inf  ;;  %v1209_v22 = vld [vmem:[%s1703_s5 + $0x8] sm:$0xff]  }
 0x644   :  { %v1163_v25 = vpop.f32.mrb[20].mxu0  ;;  %v616_v27 = vsel %vm304_vm1, %v606_v23, -inf }
 0x645   :  { %617 = vmax.xlane.f32.xlu1 %v616_v27  ;;  %v581_v29 = vpop.f32.mrb[21].mxu0  ;;  %v603_v30 = vmul.f32 %v1163_v25, %v596_v12  ;;  %v1212_v25 = vld [vmem:[%s1703_s5 + $0x20] sm:$0xff]   ;;  %v1213_v27 = vld [vmem:[%s1703_s5 + $0x28] sm:$0xff]  }
 0x646   :  { %v601_v33 = vmul.f32 %v596_v12, %v581_v29  ;;  %v1164_v34 = vpop.f32.mrb[22].mxu0 }
 0x647   :  { %620 = vmax.xlane.f32.xlu0 %v619_v35  ;;  %v584_v26 = vpop.f32.mrb[23].mxu0  ;;  %v604_v37 = vmul.f32 %v1164_v34, %v596_v12  ;;  %v611_v40 = vadd.f32 %v603_v30, %v1515_v51 }
 0x648   :  { %v602_v38 = vmul.f32 %v596_v12, %v584_v26  ;;  %v609_v32 = vadd.f32 %v601_v33, %v1504_v44 }
 0x649   :  { %623 = vmax.xlane.f32.xlu1 %v622_v31  ;;  %v612_v42 = vadd.f32 %v604_v37, %v1522_v56  ;;  %v631_v43 = vsel %vm304_vm1, %v611_v40, -inf }
 0x64a   :  { %v625_v39 = vsel %vm304_vm1, %v609_v32, -inf  ;;  %v610_v36 = vadd.f32 %v602_v38, %v1510_v50 }
 0x64b   :  { %626 = vmax.xlane.f32.xlu0 %v625_v39  ;;  %v634_v45 = vsel %vm304_vm1, %v612_v42, -inf }
 0x64c   :  { %v628_v41 = vsel %vm304_vm1, %v610_v36, -inf }
 0x64d   :  { %629 = vmax.xlane.f32.xlu1 %v628_v41 }
 0x64f   :  { %632 = vmax.xlane.f32.xlu0 %v631_v43 }
 0x651   :  { %635 = vmax.xlane.f32.xlu1 %v634_v45 }
 0x6d0   :  { %v615_v44 = vpop.xlane.xlu0 %614 }
 0x6d1   :  { %v637_v46 = vsub.f32 %v605_v16, %v615_v44  ;;  %v1208_v16 = vld [vmem:[%s1703_s5] sm:$0xff]  }
 0x6d2   :  { %v618_v47 = vpop.xlane.xlu1 %617  ;;  %1181 = vmatprep.subr.bf16.mxu1 %v1208_v16 }
 0x6d3   :  { %v645_v48 = vmul.f32 1.442695, %v637_v46  ;;  %v638_v49 = vsub.f32 %v606_v23, %v618_v47  ;;  %1182 = vmatpush3.bf16.msra.mxu1 %v1208_v16  ;;  %v1210_v23 = vld [vmem:[%s1703_s5 + $0x10] sm:$0xff]  }
 0x6d4   :  { %v621_v50 = vpop.xlane.xlu0 %620  ;;  %1183 = vmatprep.subr.bf16.mxu1 %v1209_v22 }
 0x6d5   :  { %1280 = vpow2.f32 %v645_v48  ;;  %v647_v51 = vmul.f32 1.442695, %v638_v49  ;;  %v639_v52 = vsub.f32 %v607_v24, %v621_v50  ;;  %v1211_v24 = vld [vmem:[%s1703_s5 + $0x18] sm:$0xff]  }
 0x6d6   :  { %v624_v53 = vpop.xlane.xlu1 %623 }
 0x6d7   :  { %1282 = vpow2.f32 %v647_v51  ;;  %v649_v54 = vmul.f32 1.442695, %v639_v52  ;;  %v640_v56 = vsub.f32 %v608_v28, %v624_v53  ;;  %1184 = vmatpush3.bf16.msra.mxu1 %v1209_v22  ;;  %v1214_v28 = vld [vmem:[%s1703_s5 + $0x30] sm:$0xff]  }
 0x6d8   :  { %v627_v55 = vpop.xlane.xlu0 %626  ;;  %1185 = vmatprep.subr.bf16.mxu1 %v1210_v23 }
 0x6d9   :  { %1284 = vpow2.f32 %v649_v54  ;;  %v651_v57 = vmul.f32 1.442695, %v640_v56  ;;  %v641_v58 = vsub.f32 %v609_v32, %v627_v55  ;;  %v1215_v55 = vld [vmem:[%s1703_s5 + $0x38] sm:$0xff]  }
 0x6da   :  { %v630_v59 = vpop.xlane.xlu1 %629 }
 0x6db   :  { %1286 = vpow2.f32 %v651_v57  ;;  %v653_v60 = vmul.f32 1.442695, %v641_v58  ;;  %v642_v61 = vsub.f32 %v610_v36, %v630_v59  ;;  %1186 = vmatpush3.bf16.msra.mxu1 %v1210_v23 }
 0x6dc   :  { %v633_v62 = vpop.xlane.xlu0 %632  ;;  %1187 = vmatprep.subr.bf16.mxu1 %v1211_v24 }
 0x6dd   :  { %1288 = vpow2.f32 %v653_v60  ;;  %v655_v63 = vmul.f32 1.442695, %v642_v61  ;;  %v643_v0 = vsub.f32 %v611_v40, %v633_v62 }
 0x6de   :  { %v636_v1 = vpop.xlane.xlu1 %635 }
 0x6df   :  { %v1575_v2 = vpop.eup %1280  ;;  %1290 = vpow2.f32 %v655_v63  ;;  %v657_v3 = vmul.f32 1.442695, %v643_v0  ;;  %v644_v4 = vsub.f32 %v612_v42, %v636_v1  ;;  %1188 = vmatpush3.bf16.msra.mxu1 %v1211_v24 }
 0x6e0   :  { %v661_v5 = vsel %vm304_vm1, %v1575_v2, 0.0  ;;  %1189 = vmatprep.subr.bf16.mxu1 %v1212_v25 }
 0x6e1   :  { %v1579_v6 = vpop.eup %1282  ;;  %1292 = vpow2.f32 %v657_v3  ;;  %v659_v7 = vmul.f32 1.442695, %v644_v4  ;;  %662 = vadd.xlane.f32.xlu0 %v661_v5  ;;  %v926_v5 = vlaneseq }
 0x6e2   :  { %v664_v8 = vsel %vm304_vm1, %v1579_v6, 0.0 }
 0x6e3   :  { %v1583_v9 = vpop.eup %1284  ;;  %1294 = vpow2.f32 %v659_v7  ;;  %665 = vadd.xlane.f32.xlu1 %v664_v8  ;;  %1190 = vmatpush3.bf16.msra.mxu1 %v1212_v25  ;;  %v1046_v7 = vld [vmem:[%s1704_s6] ss:$0 sm:$0xff] }
 0x6e4   :  { %v667_v10 = vsel %vm304_vm1, %v1583_v9, 0.0  ;;  %1191 = vmatprep.subr.bf16.mxu1 %v1213_v27 }
 0x6e5   :  { %v1287_v11 = vpop.eup %1286  ;;  %668 = vadd.xlane.f32.xlu0 %v667_v10 }
 0x6e6   :  { %v670_v12 = vsel %vm304_vm1, %v1287_v11, 0.0 }
 0x6e7   :  { %v1588_v13 = vpop.eup %1288  ;;  %671 = vadd.xlane.f32.xlu1 %v670_v12  ;;  %1192 = vmatpush3.bf16.msra.mxu1 %v1213_v27 }
 0x6e8   :  { %v673_v14 = vsel %vm304_vm1, %v1588_v13, 0.0  ;;  %1193 = vmatprep.subr.bf16.mxu1 %v1214_v28 }
 0x6e9   :  { %v1291_v15 = vpop.eup %1290  ;;  %674 = vadd.xlane.f32.xlu0 %v673_v14 }
 0x6ea   :  { %v676_v17 = vsel %vm304_vm1, %v1291_v15, 0.0 }
 0x6eb   :  { %v1593_v18 = vpop.eup %1292  ;;  %677 = vadd.xlane.f32.xlu1 %v676_v17  ;;  %1194 = vmatpush3.bf16.msra.mxu1 %v1214_v28 }
 0x6ec   :  { %v679_v19 = vsel %vm304_vm1, %v1593_v18, 0.0  ;;  %1195 = vmatprep.subr.bf16.mxu1 %v1215_v55 }
 0x6ed   :  { %v1295_v21 = vpop.eup %1294  ;;  %680 = vadd.xlane.f32.xlu0 %v679_v19 }
 0x6ee   :  { %v682_v20 = vsel %vm304_vm1, %v1295_v21, 0.0 }
 0x6ef   :  { %683 = vadd.xlane.f32.xlu1 %v682_v20  ;;  %1196 = vmatpush3.bf16.msra.mxu1 %v1215_v55 }
 0x76e   :  { %v663_v29 = vpop.xlane.xlu0 %662 }
 0x76f   :  { %1296 = vrcp.f32 %v663_v29 }
 0x770   :  { %v666_v30 = vpop.xlane.xlu1 %665 }
 0x771   :  { %1298 = vrcp.f32 %v666_v30 }
 0x772   :  { %v669_v33 = vpop.xlane.xlu0 %668 }
 0x773   :  { %1300 = vrcp.f32 %v669_v33 }
 0x774   :  { %v672_v34 = vpop.xlane.xlu1 %671 }
 0x775   :  { %1302 = vrcp.f32 %v672_v34 }
 0x776   :  { %v675_v35 = vpop.xlane.xlu0 %674 }
 0x777   :  { %1304 = vrcp.f32 %v675_v35 }
 0x778   :  { %v678_v26 = vpop.xlane.xlu1 %677 }
 0x779   :  { %v1297_v37 = vpop.eup %1296  ;;  %1306 = vrcp.f32 %v678_v26 }
 0x77a   :  { %v681_v38 = vpop.xlane.xlu0 %680  ;;  %v693_v39 = vmul.f32 %v1297_v37, %v1575_v2 }
 0x77b   :  { %v1299_v31 = vpop.eup %1298  ;;  %1308 = vrcp.f32 %v681_v38 }
 0x77c   :  { %v684_v32 = vpop.xlane.xlu1 %683  ;;  %v694_v36 = vmul.f32 %v1299_v31, %v1579_v6  ;;  %v927_v6 = vand.u32 127, %v926_v5 }
 0x77d   :  { %v1301_v40 = vpop.eup %1300  ;;  %1310 = vrcp.f32 %v684_v32 }
 0x77e   :  { %v701_v41 = vpack.c.bf16 %v694_v36, %v693_v39  ;;  %v695_v43 = vmul.f32 %v1301_v40, %v1583_v9  ;;  %vm928_vm2 = vcmp.lt.s32.totalorder %v927_v6, 8 }
 0x77f   :  { %v1303_v42 = vpop.eup %1302 }
 0x780   :  { %v696_v45 = vmul.f32 %v1303_v42, %v1287_v11  ;;  %1173 = vmatprep.mubr.msk.bf16.mxu0 %vm304_vm1, %v701_v41 }
 0x781   :  { %v1305_v44 = vpop.eup %1304 }
 0x782   :  { %v702_v46 = vpack.c.bf16 %v696_v45, %v695_v43  ;;  %v697_v48 = vmul.f32 %v1305_v44, %v1588_v13 }
 0x783   :  { %v1307_v47 = vpop.eup %1306 }
 0x784   :  { %1174 = vmatmul.mubr.msk.bf16.vlgmr.msra.gmra.mrb[24].mxu0 %vm304_vm1, %v702_v46  ;;  %v698_v49 = vmul.f32 %v1307_v47, %v1291_v15 }
 0x785   :  { %v1309_v50 = vpop.eup %1308 }
 0x786   :  { %v703_v51 = vpack.c.bf16 %v698_v49, %v697_v48  ;;  %v699_v53 = vmul.f32 %v1309_v50, %v1593_v18 }
 0x787   :  { %v1311_v52 = vpop.eup %1310 }
 0x788   :  { %1177 = vmatprep.mubr.msk.bf16.mxu0 %vm304_vm1, %v703_v51  ;;  %v700_v54 = vmul.f32 %v1311_v52, %v1295_v21 }
 0x78a   :  { %v704_v56 = vpack.c.bf16 %v700_v54, %v699_v53 }
 0x78c   :  { %1178 = vmatmul.mubr.msk.bf16.gmra.mrb[28].mxu0 %vm304_vm1, %v704_v56 }
 0x857   :  { %v1175_v57 = vpop.f32.mrb[24].mxu0 }
 0x858   :  { %v755_v58 = vpop.f32.mrb[25].mxu0 }
 0x859   :  { %v1176_v59 = vpop.f32.mrb[26].mxu0 }
 0x85a   :  { %v787_v60 = vpack.c.bf16 %v1176_v59, %v1175_v57  ;;  %v758_v61 = vpop.f32.mrb[27].mxu0 }
 0x85b   :  { %v786_v62 = vpack.c.bf16 %v758_v61, %v755_v58 }
 0x85d   :  { %1197 = vmatprep.mubr.bf16.mxu1 %v786_v62 }
 0x85e   :  { %1198 = vmatmul.mubr.bf16.vlgmr.msra.gmra.mrb[8].mxu1 %v787_v60 }
 0x85f   :  { %v1179_v63 = vpop.f32.mrb[28].mxu0 }
 0x860   :  { %v771_v0 = vpop.f32.mrb[29].mxu0 }
 0x861   :  { %v1180_v1 = vpop.f32.mrb[30].mxu0 }
 0x862   :  { %v789_v2 = vpack.c.bf16 %v1180_v1, %v1179_v63  ;;  %v774_v3 = vpop.f32.mrb[31].mxu0 }
 0x863   :  { %v788_v4 = vpack.c.bf16 %v774_v3, %v771_v0 }
 0x865   :  { %1201 = vmatprep.mubr.bf16.mxu1 %v788_v4 }
 0x866   :  { %1202 = vmatmul.mubr.bf16.gmra.mrb[12].mxu1 %v789_v2 }
 0x931   :  { %v1199_v8 = vpop.f32.mrb[8].mxu1 }
 0x932   :  { %v904_v9 = vadd.f32 %v1199_v8, %v1046_v7  ;;  %v895_v10 = vpop.f32.mrb[9].mxu1 }
 0x933   :  { %v1200_v11 = vpop.f32.mrb[10].mxu1  ;;  %v896_v12 = vadd.f32 %v1046_v7, %v895_v10 }
 0x934   :  { %v907_v13 = vadd.f32 %v1200_v11, %v1046_v7  ;;  %v898_v14 = vpop.f32.mrb[11].mxu1  ;;  %v931_v15 = vsel %vm928_vm2, %v904_v9, -1e+30 }
 0x935   :  { %941 = vmax.xlane.f32.xlu0 %v931_v15  ;;  %v899_v17 = vadd.f32 %v1046_v7, %v898_v14  ;;  %v929_v19 = vsel %vm928_vm2, %v896_v12, -1e+30 }
 0x936   :  { %v932_v18 = vsel %vm928_vm2, %v907_v13, -1e+30 }
 0x937   :  { %943 = vmax.xlane.f32.xlu1 %v932_v18  ;;  %v930_v16 = vsel %vm928_vm2, %v899_v17, -1e+30 }
 0x939   :  { %937 = vmax.xlane.f32.xlu0 %v929_v19  ;;  %v1203_v21 = vpop.f32.mrb[12].mxu1 }
 0x93a   :  { %v911_v20 = vpop.f32.mrb[13].mxu1  ;;  %v920_v25 = vadd.f32 %v1203_v21, %v1046_v7 }
 0x93b   :  { %v912_v22 = vadd.f32 %v1046_v7, %v911_v20  ;;  %939 = vmax.xlane.f32.xlu1 %v930_v16  ;;  %v1204_v23 = vpop.f32.mrb[14].mxu1 }
 0x93c   :  { %v914_v24 = vpop.f32.mrb[15].mxu1  ;;  %v923_v29 = vadd.f32 %v1204_v23, %v1046_v7  ;;  %v935_v33 = vsel %vm928_vm2, %v920_v25, -1e+30 }
 0x93d   :  { %v915_v27 = vadd.f32 %v1046_v7, %v914_v24  ;;  %v933_v28 = vsel %vm928_vm2, %v912_v22, -1e+30 }
 0x93e   :  { %945 = vmax.xlane.f32.xlu0 %v933_v28  ;;  %v936_v34 = vsel %vm928_vm2, %v923_v29, -1e+30 }
 0x93f   :  { %v934_v30 = vsel %vm928_vm2, %v915_v27, -1e+30 }
 0x940   :  { %947 = vmax.xlane.f32.xlu1 %v934_v30 }
 0x942   :  { %949 = vmax.xlane.f32.xlu0 %v935_v33 }
 0x944   :  { %951 = vmax.xlane.f32.xlu1 %v936_v34 }
 0x9c2   :  { %v942_v35 = vpop.xlane.xlu0 %941 }
 0x9c3   :  { %v1642_v26 = vsub.f32 %v931_v15, %v942_v35 }
 0x9c4   :  { %v944_v37 = vpop.xlane.xlu1 %943 }
 0x9c5   :  { %v965_v38 = vmul.f32 1.442695, %v1642_v26  ;;  %v1645_v31 = vsub.f32 %v932_v18, %v944_v37 }
 0x9c6   :  { %v938_v32 = vpop.xlane.xlu0 %937 }
 0x9c7   :  { %1312 = vpow2.f32 %v965_v38  ;;  %v967_v39 = vmul.f32 1.442695, %v1645_v31  ;;  %v1648_v36 = vsub.f32 %v929_v19, %v938_v32 }
 0x9c8   :  { %v940_v40 = vpop.xlane.xlu1 %939 }
 0x9c9   :  { %1314 = vpow2.f32 %v967_v39  ;;  %v961_v41 = vmul.f32 1.442695, %v1648_v36  ;;  %v1651_v42 = vsub.f32 %v930_v16, %v940_v40 }
 0x9cb   :  { %1316 = vpow2.f32 %v961_v41  ;;  %v963_v43 = vmul.f32 1.442695, %v1651_v42  ;;  %v946_v45 = vpop.xlane.xlu0 %945 }
 0x9cc   :  { %v1654_v44 = vsub.f32 %v933_v28, %v946_v45 }
 0x9cd   :  { %1318 = vpow2.f32 %v963_v43  ;;  %v948_v46 = vpop.xlane.xlu1 %947 }
 0x9ce   :  { %v969_v47 = vmul.f32 1.442695, %v1654_v44  ;;  %v1657_v48 = vsub.f32 %v934_v30, %v948_v46 }
 0x9cf   :  { %v950_v49 = vpop.xlane.xlu0 %949 }
 0x9d0   :  { %1320 = vpow2.f32 %v969_v47  ;;  %v971_v50 = vmul.f32 1.442695, %v1657_v48  ;;  %v1660_v51 = vsub.f32 %v935_v33, %v950_v49 }
 0x9d1   :  { %v1313_v52 = vpop.eup %1312  ;;  %v952_v53 = vpop.xlane.xlu1 %951 }
 0x9d2   :  { %1322 = vpow2.f32 %v971_v50  ;;  %v973_v54 = vmul.f32 1.442695, %v1660_v51  ;;  %v1663_v56 = vsub.f32 %v936_v34, %v952_v53  ;;  %981 = vadd.xlane.f32.xlu0 %v1313_v52 }
 0x9d3   :  { %v1315_v55 = vpop.eup %1314 }
 0x9d4   :  { %1324 = vpow2.f32 %v973_v54  ;;  %v975_v57 = vmul.f32 1.442695, %v1663_v56  ;;  %983 = vadd.xlane.f32.xlu1 %v1315_v55 }
 0x9d5   :  { %v1317_v58 = vpop.eup %1316 }
 0x9d6   :  { %1326 = vpow2.f32 %v975_v57  ;;  %977 = vadd.xlane.f32.xlu0 %v1317_v58 }
 0x9d7   :  { %v1319_v59 = vpop.eup %1318 }
 0x9d8   :  { %979 = vadd.xlane.f32.xlu1 %v1319_v59 }
 0x9da   :  { %v1321_v60 = vpop.eup %1320 }
 0x9db   :  { %985 = vadd.xlane.f32.xlu0 %v1321_v60 }
 0x9dc   :  { %v1323_v61 = vpop.eup %1322 }
 0x9dd   :  { %987 = vadd.xlane.f32.xlu1 %v1323_v61 }
 0x9de   :  { %v1325_v62 = vpop.eup %1324 }
 0x9df   :  { %989 = vadd.xlane.f32.xlu0 %v1325_v62 }
 0x9e0   :  { %v1327_v63 = vpop.eup %1326 }
 0x9e1   :  { %991 = vadd.xlane.f32.xlu1 %v1327_v63 }
 0xa5f   :  { %v982_v0 = vpop.xlane.xlu0 %981 }
 0xa60   :  { %1328 = vlog2.f32 %v982_v0 }
 0xa61   :  { %v984_v1 = vpop.xlane.xlu1 %983 }
 0xa62   :  { %1330 = vlog2.f32 %v984_v1 }
 0xa63   :  { %v978_v2 = vpop.xlane.xlu0 %977 }
 0xa64   :  { %1332 = vlog2.f32 %v978_v2 }
 0xa65   :  { %v980_v3 = vpop.xlane.xlu1 %979 }
 0xa66   :  { %1334 = vlog2.f32 %v980_v3 }
 0xa68   :  { %v986_v4 = vpop.xlane.xlu0 %985 }
 0xa69   :  { %1336 = vlog2.f32 %v986_v4 }
 0xa6a   :  { %v1329_v5 = vpop.eup %1328  ;;  %v988_v6 = vpop.xlane.xlu1 %987 }
 0xa6b   :  { %v998_v7 = vmul.f32 0.6931472, %v1329_v5  ;;  %1338 = vlog2.f32 %v988_v6 }
 0xa6c   :  { %v1331_v8 = vpop.eup %1330  ;;  %v990_v9 = vpop.xlane.xlu0 %989 }
 0xa6d   :  { %v1011_v10 = vsub.f32 %v1642_v26, %v998_v7  ;;  %v1000_v11 = vmul.f32 0.6931472, %v1331_v8  ;;  %1340 = vlog2.f32 %v990_v9 }
 0xa6e   :  { %v1333_v12 = vpop.eup %1332  ;;  %v992_v13 = vpop.xlane.xlu1 %991 }
 0xa6f   :  { %1019 = vst [vmem:[%s1705_s7 + $0x10] sm:$0xff] %v1011_v10  ;;  %v1012_v14 = vsub.f32 %v1645_v31, %v1000_v11  ;;  %v994_v15 = vmul.f32 0.6931472, %v1333_v12  ;;  %1342 = vlog2.f32 %v992_v13 }
 0xa70   :  { %v1335_v17 = vpop.eup %1334 }
 0xa71   :  { %1020 = vst [vmem:[%s1705_s7 + $0x18] sm:$0xff] %v1012_v14  ;;  %v1009_v18 = vsub.f32 %v1648_v36, %v994_v15  ;;  %v996_v19 = vmul.f32 0.6931472, %v1335_v17 }
 0xa73   :  { %v1337_v21 = vpop.eup %1336  ;;  %1017 = vst [vmem:[%s1705_s7] sm:$0xff] %v1009_v18  ;;  %v1010_v20 = vsub.f32 %v1651_v42, %v996_v19 }
 0xa74   :  { %v1002_v16 = vmul.f32 0.6931472, %v1337_v21 }
 0xa75   :  { %v1339_v22 = vpop.eup %1338  ;;  %1018 = vst [vmem:[%s1705_s7 + $0x8] sm:$0xff] %v1010_v20 }
 0xa76   :  { %v1013_v23 = vsub.f32 %v1654_v44, %v1002_v16  ;;  %v1004_v24 = vmul.f32 0.6931472, %v1339_v22 }
 0xa77   :  { %v1341_v25 = vpop.eup %1340 }
 0xa78   :  { %1021 = vst [vmem:[%s1705_s7 + $0x20] sm:$0xff] %v1013_v23  ;;  %v1014_v27 = vsub.f32 %v1657_v48, %v1004_v24  ;;  %v1006_v28 = vmul.f32 0.6931472, %v1341_v25 }
 0xa79   :  { %v1343_v29 = vpop.eup %1342 }
 0xa7a   :  { %1022 = vst [vmem:[%s1705_s7 + $0x28] sm:$0xff] %v1014_v27  ;;  %v1015_v30 = vsub.f32 %v1660_v51, %v1006_v28  ;;  %v1008_v33 = vmul.f32 0.6931472, %v1343_v29 }
 0xa7c   :  { %1023 = vst [vmem:[%s1705_s7 + $0x30] sm:$0xff] %v1015_v30  ;;  %v1016_v34 = vsub.f32 %v1663_v56, %v1008_v33 }
 0xa7e   :  { %1024 = vst [vmem:[%s1705_s7 + $0x38] sm:$0xff] %v1016_v34 }
 0xa7f   :  { %1029 = vsyncpa [#allocation3], 1 }

</bundles_post_ra>
